<compile_context>
chip_gen: v6e
topology: v6e:2x2x1
jax: 0.10.0
libtpu: 0.0.40
codegen_flags: <defaults>
</compile_context>

<pallas_src>
import functools

import jax
import jax.numpy as jnp
from jax.experimental import pallas as pl
from jax.experimental.pallas import tpu as pltpu

LANE = 128
SUBLANE = 8


def _round_up(v, m):
    return (v + m - 1) // m * m


# ----------------------------- Pallas kernel ------------------------------- #

def _chebnet_fused_kernel(x_ref, s_ref, w10_ref, w11_ref, b1_ref,
                          w20_ref, w21_ref, b2_ref,
                          logits_ref, logp_ref,
                          h_ref, hw_ref, *, tm, num_classes):
    """Fused 2-layer ChebConv (K=2) + log_softmax.

    Grid axis 0 tiles the output rows. Layer 1 (which needs the whole graph)
    is computed once at step 0 into VMEM scratch; every step then produces a
    lane-dense [tm, C_PAD] tile of logits and log-probabilities.
    """
    i = pl.program_id(0)

    @pl.when(i == 0)
    def _():
        x = x_ref[...]                                            # bf16 [N, F]
        s = s_ref[...]                                            # bf16 [N, N]
        sx = jnp.dot(s, x, preferred_element_type=jnp.float32)    # S @ X
        h = (jnp.dot(x, w10_ref[...], preferred_element_type=jnp.float32)
             + jnp.dot(sx.astype(jnp.bfloat16), w11_ref[...],
                       preferred_element_type=jnp.float32)
             + b1_ref[...])
        h = jnp.maximum(h, 0.0).astype(jnp.bfloat16)              # relu(conv1)
        # TODO(synk): F.dropout with training=True would need pltpu.prng_*;
        # the module is evaluated in inference mode, so dropout is identity.
        h_ref[...] = h
        # Reassociate (S @ h) @ W2_1 == S @ (h @ W2_1); cache h @ W2_1 so the
        # per-tile O(N^2) matmul has a 128-lane RHS.
        hw_ref[...] = jnp.dot(
            h, w21_ref[...], preferred_element_type=jnp.float32
        ).astype(jnp.bfloat16)

    row0 = pl.multiple_of(i * tm, tm)
    s_rows = s_ref[pl.ds(row0, tm), :]                            # [tm, N]
    h_rows = h_ref[pl.ds(row0, tm), :]                            # [tm, H]
    logits = (jnp.dot(h_rows, w20_ref[...], preferred_element_type=jnp.float32)
              + jnp.dot(s_rows, hw_ref[...], preferred_element_type=jnp.float32)
              + b2_ref[...])
    logits_ref[...] = logits

    # log_softmax over the padded class axis; padded lanes masked out first.
    col = jax.lax.broadcasted_iota(jnp.int32, logits.shape, 1)
    masked = jnp.where(col < num_classes, logits, jnp.float32(-1e30))
    m = jnp.max(masked, axis=1, keepdims=True)
    z = masked - m
    lse = jnp.log(jnp.sum(jnp.exp(z), axis=1, keepdims=True))
    logp_ref[...] = z - lse


# ------------------------------ Wrapper ------------------------------------ #

def _pad2(a, rows, cols, dtype):
    out = jnp.zeros((rows, cols), jnp.float32)
    out = out.at[: a.shape[0], : a.shape[1]].set(a)
    return out.astype(dtype)


def chebnet_forward(x, s, params):
    """Full ChebNet forward. Returns (log_softmax(y, axis=1), y)."""
    w10, w11, b1, w20, w21, b2 = params
    n, f_in = x.shape
    hidden = w10.shape[1]
    num_classes = w20.shape[1]

    # Lane-dense padding: feature/hidden/class dims -> multiples of 128 lanes,
    # node dim -> multiple of the row tile.
    f_pad = _round_up(f_in, LANE)
    h_pad = _round_up(hidden, LANE)
    c_pad = _round_up(num_classes, LANE)
    if n <= 128:
        n_pad = _round_up(n, SUBLANE)
        tm = n_pad
    else:
        # TODO(synk): re-derive TM per generation (v7x: 64 MiB VMEM) once S no
        # longer fits resident; this fused design keeps S resident in VMEM.
        tm = 128
        n_pad = _round_up(n, tm)

    xp = _pad2(x, n_pad, f_pad, jnp.bfloat16)
    sp = _pad2(s, n_pad, n_pad, jnp.bfloat16)
    w10p = _pad2(w10, f_pad, h_pad, jnp.bfloat16)
    w11p = _pad2(w11, f_pad, h_pad, jnp.bfloat16)
    b1p = _pad2(b1, 1, h_pad, jnp.float32)
    w20p = _pad2(w20, h_pad, c_pad, jnp.bfloat16)
    w21p = _pad2(w21, h_pad, c_pad, jnp.bfloat16)
    b2p = _pad2(b2, 1, c_pad, jnp.float32)

    def resident(shape):
        return pl.BlockSpec(shape, lambda i: (0, 0))

    flops = 2 * n_pad * (n_pad * f_pad            # S @ X
                         + 2 * f_pad * h_pad      # X@W1_0, (SX)@W1_1
                         + 2 * h_pad * c_pad      # h@W2_0, h@W2_1
                         + n_pad * c_pad)         # S @ (h@W2_1)
    in_bytes = (xp.size + sp.size + w10p.size + w11p.size
                + w20p.size + w21p.size) * 2 + (b1p.size + b2p.size) * 4
    out_bytes = 2 * n_pad * c_pad * 4
    cost = pl.CostEstimate(flops=flops,
                           transcendentals=n_pad * (c_pad + 1),
                           bytes_accessed=in_bytes + out_bytes)

    kernel = functools.partial(_chebnet_fused_kernel, tm=tm,
                               num_classes=num_classes)
    logits_pad, logp_pad = pl.pallas_call(
        kernel,
        out_shape=(jax.ShapeDtypeStruct((n_pad, c_pad), jnp.float32),   # y
                   jax.ShapeDtypeStruct((n_pad, c_pad), jnp.float32)),  # logp
        grid_spec=pltpu.PrefetchScalarGridSpec(
            num_scalar_prefetch=0,
            grid=(n_pad // tm,),
            in_specs=[
                resident((n_pad, f_pad)),   # X
                resident((n_pad, n_pad)),   # S
                resident((f_pad, h_pad)),   # W1_0
                resident((f_pad, h_pad)),   # W1_1
                resident((1, h_pad)),       # b1
                resident((h_pad, c_pad)),   # W2_0
                resident((h_pad, c_pad)),   # W2_1
                resident((1, c_pad)),       # b2
            ],
            out_specs=(pl.BlockSpec((tm, c_pad), lambda i: (i, 0)),
                       pl.BlockSpec((tm, c_pad), lambda i: (i, 0))),
            scratch_shapes=[pltpu.VMEM((n_pad, h_pad), jnp.bfloat16),    # h
                            pltpu.VMEM((n_pad, c_pad), jnp.bfloat16)]),  # h@W2_1
        compiler_params=pltpu.CompilerParams(
            # Row axis must stay "arbitrary": later row tiles read the scratch
            # written at grid step 0 (cross-step dep -> no megacore split).
            dimension_semantics=("arbitrary",),
            vmem_limit_bytes=48 * 1024 * 1024,
        ),
        cost_estimate=cost,
    )(xp, sp, w10p, w11p, b1p, w20p, w21p, b2p)

    return logp_pad[:n, :num_classes], logits_pad[:n, :num_classes]


chebnet_forward_jit = jax.jit(chebnet_forward)


# ------------------------------ Glue (JAX) --------------------------------- #

def scaled_laplacian_from_edges(edge_index, num_nodes):
    """Dense S = 2*L_sym/lambda_max - I with lambda_max=2  ->  -D^{-1/2} A D^{-1/2}."""
    src, dst = edge_index
    a = jnp.zeros((num_nodes, num_nodes), jnp.float32).at[src, dst].set(1.0)
    a = a * (1.0 - jnp.eye(num_nodes, dtype=jnp.float32))   # drop self loops
    deg = jnp.sum(a, axis=1)
    d_inv_sqrt = jnp.where(deg > 0, 1.0 / jnp.sqrt(deg), 0.0)
    return -(d_inv_sqrt[:, None] * a * d_inv_sqrt[None, :])


def init_params(key, num_features, hidden, num_classes):
    """Deterministic glorot-style init of ChebConv weights (K=2) + zero bias."""
    k1, k2, k3, k4 = jax.random.split(key, 4)

    def glorot(k, fan_in, fan_out):
        limit = jnp.sqrt(6.0 / (fan_in + fan_out))
        return jax.random.uniform(k, (fan_in, fan_out), jnp.float32, -limit, limit)

    w1_0 = glorot(k1, num_features, hidden)
    w1_1 = glorot(k2, num_features, hidden)
    b1 = jnp.zeros((1, hidden), jnp.float32)
    w2_0 = glorot(k3, hidden, num_classes)
    w2_1 = glorot(k4, hidden, num_classes)
    b2 = jnp.zeros((1, num_classes), jnp.float32)
    return (w1_0, w1_1, b1, w2_0, w2_1, b2)


def chebnet_reference(x, s, params):
    """Pure-JAX reference mirroring the kernel's bf16 operand rounding."""
    w10, w11, b1, w20, w21, b2 = params
    bf = lambda a: a.astype(jnp.bfloat16).astype(jnp.float32)
    xr, sr = bf(x), bf(s)
    sx = bf(sr @ xr)
    h = jnp.maximum(xr @ bf(w10) + sx @ bf(w11) + b1, 0.0)
    hb = bf(h)
    hw = bf(hb @ bf(w21))
    y = hb @ bf(w20) + sr @ hw + b2
    return jax.nn.log_softmax(y, axis=1), y


# --------------------------------- Main ------------------------------------ #

if __name__ == "__main__":
    N = 16             # nodes
    NUM_FEATURES = 8   # args.num_features
    HIDDEN = 32        # ChebConv hidden size (fixed by module)
    NUM_CLASSES = 4    # args.num_classes

    key = jax.random.PRNGKey(0)
    kx, kp = jax.random.split(key)

    # Node features.
    x = jax.random.normal(kx, (N, NUM_FEATURES), jnp.float32)

    # Deterministic ring graph (bidirectional edges).
    nodes = jnp.arange(N)
    src = jnp.concatenate([nodes, (nodes + 1) % N])
    dst = jnp.concatenate([(nodes + 1) % N, nodes])
    edge_index = jnp.stack([src, dst])                 # [2, E]

    s = scaled_laplacian_from_edges(edge_index, N)     # [N, N]
    params = init_params(kp, NUM_FEATURES, HIDDEN, NUM_CLASSES)

    logp, logits = chebnet_forward_jit(x, s, params)
    jax.block_until_ready((logp, logits))

    ref_logp, ref_logits = chebnet_reference(x, s, params)
    assert logp.shape == (N, NUM_CLASSES) and logits.shape == (N, NUM_CLASSES)
    assert jnp.allclose(logits, ref_logits, atol=1e-2, rtol=1e-2)
    assert jnp.allclose(logp, ref_logp, atol=1e-2, rtol=1e-2)

    print("KERNEL_OK")
</pallas_src>

<mosaic_0001>
module attributes {stable_mosaic.version = 11 : i64} {
  func.func @_chebnet_fused_kernel(%arg0: i32, %arg1: memref<16x128xbf16, #tpu.memory_space<vmem>>, %arg2: memref<16x16xbf16, #tpu.memory_space<vmem>>, %arg3: memref<128x128xbf16, #tpu.memory_space<vmem>>, %arg4: memref<128x128xbf16, #tpu.memory_space<vmem>>, %arg5: memref<1x128xf32, #tpu.memory_space<vmem>>, %arg6: memref<128x128xbf16, #tpu.memory_space<vmem>>, %arg7: memref<128x128xbf16, #tpu.memory_space<vmem>>, %arg8: memref<1x128xf32, #tpu.memory_space<vmem>>, %arg9: memref<16x128xf32, #tpu.memory_space<vmem>>, %arg10: memref<16x128xf32, #tpu.memory_space<vmem>>, %arg11: memref<16x128xbf16, #tpu.memory_space<vmem>>, %arg12: memref<16x128xbf16, #tpu.memory_space<vmem>>) attributes {dimension_semantics = [#tpu.dimension_semantics<arbitrary>], iteration_bounds = array<i64: 1>, scalar_prefetch = 0 : i64, scratch_operands = 2 : i64, tpu.core_type = #tpu.core_type<tc>, window_params = [{pipeline_mode = #tpu.pipeline_mode<synchronous>, transform_indices = @transform_0, window_bounds = array<i64: 16, 128>}, {pipeline_mode = #tpu.pipeline_mode<synchronous>, transform_indices = @transform_1, window_bounds = array<i64: 16, 16>}, {pipeline_mode = #tpu.pipeline_mode<synchronous>, transform_indices = @transform_2, window_bounds = array<i64: 128, 128>}, {pipeline_mode = #tpu.pipeline_mode<synchronous>, transform_indices = @transform_3, window_bounds = array<i64: 128, 128>}, {pipeline_mode = #tpu.pipeline_mode<synchronous>, transform_indices = @transform_4, window_bounds = array<i64: 1, 128>}, {pipeline_mode = #tpu.pipeline_mode<synchronous>, transform_indices = @transform_5, window_bounds = array<i64: 128, 128>}, {pipeline_mode = #tpu.pipeline_mode<synchronous>, transform_indices = @transform_6, window_bounds = array<i64: 128, 128>}, {pipeline_mode = #tpu.pipeline_mode<synchronous>, transform_indices = @transform_7, window_bounds = array<i64: 1, 128>}, {transform_indices = @transform_8, window_bounds = array<i64: 16, 128>}, {transform_indices = @transform_9, window_bounds = array<i64: 16, 128>}]} {
    %c0_i32 = arith.constant 0 : i32
    %0 = arith.cmpi eq, %arg0, %c0_i32 : i32
    %1 = arith.extui %0 : i1 to i32
    %c0_i32_0 = arith.constant 0 : i32
    %2 = arith.cmpi ne, %1, %c0_i32_0 : i32
    scf.if %2 {
      %c0_16 = arith.constant 0 : index
      %c0_17 = arith.constant 0 : index
      %34 = vector.load %arg1[%c0_16, %c0_17] : memref<16x128xbf16, #tpu.memory_space<vmem>>, vector<16x128xbf16>
      %c0_18 = arith.constant 0 : index
      %c0_19 = arith.constant 0 : index
      %35 = vector.load %arg2[%c0_18, %c0_19] : memref<16x16xbf16, #tpu.memory_space<vmem>>, vector<16x16xbf16>
      %cst_20 = arith.constant dense<0.000000e+00> : vector<16x128xf32>
      %36 = tpu.matmul %35, %34, %cst_20 {dimension_numbers = #tpu.dot_dimension_numbers<[1], [0], [0], [1], [0, 0, 1, 1], [], []>} : vector<16x16xbf16>, vector<16x128xbf16>, vector<16x128xf32> -> vector<16x128xf32>
      %c0_21 = arith.constant 0 : index
      %c0_22 = arith.constant 0 : index
      %37 = vector.load %arg3[%c0_21, %c0_22] : memref<128x128xbf16, #tpu.memory_space<vmem>>, vector<128x128xbf16>
      %cst_23 = arith.constant dense<0.000000e+00> : vector<16x128xf32>
      %38 = tpu.matmul %34, %37, %cst_23 {dimension_numbers = #tpu.dot_dimension_numbers<[1], [0], [0], [1], [0, 0, 1, 1], [], []>} : vector<16x128xbf16>, vector<128x128xbf16>, vector<16x128xf32> -> vector<16x128xf32>
      %39 = arith.truncf %36 : vector<16x128xf32> to vector<16x128xbf16>
      %c0_24 = arith.constant 0 : index
      %c0_25 = arith.constant 0 : index
      %40 = vector.load %arg4[%c0_24, %c0_25] : memref<128x128xbf16, #tpu.memory_space<vmem>>, vector<128x128xbf16>
      %cst_26 = arith.constant dense<0.000000e+00> : vector<16x128xf32>
      %41 = tpu.matmul %39, %40, %cst_26 {dimension_numbers = #tpu.dot_dimension_numbers<[1], [0], [0], [1], [0, 0, 1, 1], [], []>} : vector<16x128xbf16>, vector<128x128xbf16>, vector<16x128xf32> -> vector<16x128xf32>
      %42 = arith.addf %38, %41 : vector<16x128xf32>
      %c0_27 = arith.constant 0 : index
      %c0_28 = arith.constant 0 : index
      %43 = vector.load %arg5[%c0_27, %c0_28] : memref<1x128xf32, #tpu.memory_space<vmem>>, vector<1x128xf32>
      %44 = vector.broadcast %43 : vector<1x128xf32> to vector<16x128xf32>
      %45 = arith.addf %42, %44 : vector<16x128xf32>
      %cst_29 = arith.constant 0.000000e+00 : f32
      %46 = vector.broadcast %cst_29 : f32 to vector<16x128xf32>
      %47 = arith.maximumf %45, %46 : vector<16x128xf32>
      %48 = arith.truncf %47 : vector<16x128xf32> to vector<16x128xbf16>
      %c0_30 = arith.constant 0 : index
      %c0_31 = arith.constant 0 : index
      %49 = vector.load %arg11[%c0_30, %c0_31] : memref<16x128xbf16, #tpu.memory_space<vmem>>, vector<16x128xbf16>
      tpu.vector_store %arg11[%c0_30, %c0_31], %48 {strides = array<i32>} : memref<16x128xbf16, #tpu.memory_space<vmem>>, vector<16x128xbf16>,
      %c0_32 = arith.constant 0 : index
      %c0_33 = arith.constant 0 : index
      %50 = vector.load %arg7[%c0_32, %c0_33] : memref<128x128xbf16, #tpu.memory_space<vmem>>, vector<128x128xbf16>
      %cst_34 = arith.constant dense<0.000000e+00> : vector<16x128xf32>
      %51 = tpu.matmul %48, %50, %cst_34 {dimension_numbers = #tpu.dot_dimension_numbers<[1], [0], [0], [1], [0, 0, 1, 1], [], []>} : vector<16x128xbf16>, vector<128x128xbf16>, vector<16x128xf32> -> vector<16x128xf32>
      %52 = arith.truncf %51 : vector<16x128xf32> to vector<16x128xbf16>
      %c0_35 = arith.constant 0 : index
      %c0_36 = arith.constant 0 : index
      %53 = vector.load %arg12[%c0_35, %c0_36] : memref<16x128xbf16, #tpu.memory_space<vmem>>, vector<16x128xbf16>
      tpu.vector_store %arg12[%c0_35, %c0_36], %52 {strides = array<i32>} : memref<16x128xbf16, #tpu.memory_space<vmem>>, vector<16x128xbf16>,
    } else {
    }
    %c16_i32 = arith.constant 16 : i32
    %3 = arith.muli %arg0, %c16_i32 : i32
    %4 = tpu.assume_multiple %3, 16 : i32
    %5 = arith.index_cast %4 : i32 to index
    %c0 = arith.constant 0 : index
    %6 = vector.load %arg2[%5, %c0] : memref<16x16xbf16, #tpu.memory_space<vmem>>, vector<16x16xbf16>
    %7 = arith.index_cast %4 : i32 to index
    %c0_1 = arith.constant 0 : index
    %8 = vector.load %arg11[%7, %c0_1] : memref<16x128xbf16, #tpu.memory_space<vmem>>, vector<16x128xbf16>
    %c0_2 = arith.constant 0 : index
    %c0_3 = arith.constant 0 : index
    %9 = vector.load %arg6[%c0_2, %c0_3] : memref<128x128xbf16, #tpu.memory_space<vmem>>, vector<128x128xbf16>
    %cst = arith.constant dense<0.000000e+00> : vector<16x128xf32>
    %10 = tpu.matmul %8, %9, %cst {dimension_numbers = #tpu.dot_dimension_numbers<[1], [0], [0], [1], [0, 0, 1, 1], [], []>} : vector<16x128xbf16>, vector<128x128xbf16>, vector<16x128xf32> -> vector<16x128xf32>
    %c0_4 = arith.constant 0 : index
    %c0_5 = arith.constant 0 : index
    %11 = vector.load %arg12[%c0_4, %c0_5] : memref<16x128xbf16, #tpu.memory_space<vmem>>, vector<16x128xbf16>
    %cst_6 = arith.constant dense<0.000000e+00> : vector<16x128xf32>
    %12 = tpu.matmul %6, %11, %cst_6 {dimension_numbers = #tpu.dot_dimension_numbers<[1], [0], [0], [1], [0, 0, 1, 1], [], []>} : vector<16x16xbf16>, vector<16x128xbf16>, vector<16x128xf32> -> vector<16x128xf32>
    %13 = arith.addf %10, %12 : vector<16x128xf32>
    %c0_7 = arith.constant 0 : index
    %c0_8 = arith.constant 0 : index
    %14 = vector.load %arg8[%c0_7, %c0_8] : memref<1x128xf32, #tpu.memory_space<vmem>>, vector<1x128xf32>
    %15 = vector.broadcast %14 : vector<1x128xf32> to vector<16x128xf32>
    %16 = arith.addf %13, %15 : vector<16x128xf32>
    %c0_9 = arith.constant 0 : index
    %c0_10 = arith.constant 0 : index
    %17 = vector.load %arg9[%c0_9, %c0_10] : memref<16x128xf32, #tpu.memory_space<vmem>>, vector<16x128xf32>
    tpu.vector_store %arg9[%c0_9, %c0_10], %16 {strides = array<i32>} : memref<16x128xf32, #tpu.memory_space<vmem>>, vector<16x128xf32>,
    %18 = tpu.iota {dimensions = array<i32: 1>} : vector<16x128xi32>
    %c4_i32 = arith.constant 4 : i32
    %19 = vector.broadcast %c4_i32 : i32 to vector<16x128xi32>
    %20 = arith.cmpi slt, %18, %19 : vector<16x128xi32>
    %cst_11 = arith.constant -1.000000e+30 : f32
    %21 = vector.broadcast %cst_11 : f32 to vector<16x128xf32>
    %22 = arith.select %20, %16, %21 : vector<16x128xi1>, vector<16x128xf32>
    %cst_12 = arith.constant dense<0xFF800000> : vector<16xf32>
    %23 = vector.multi_reduction <maximumf>, %22, %cst_12 [1] : vector<16x128xf32> to vector<16xf32>
    %24 = vector.shape_cast %23 : vector<16xf32> to vector<16x1xf32>
    %25 = vector.broadcast %24 : vector<16x1xf32> to vector<16x128xf32>
    %26 = arith.subf %22, %25 : vector<16x128xf32>
    %27 = math.exp %26 : vector<16x128xf32>
    %cst_13 = arith.constant dense<0.000000e+00> : vector<16xf32>
    %28 = vector.multi_reduction <add>, %27, %cst_13 [1] : vector<16x128xf32> to vector<16xf32>
    %29 = vector.shape_cast %28 : vector<16xf32> to vector<16x1xf32>
    %30 = math.log %29 : vector<16x1xf32>
    %31 = vector.broadcast %30 : vector<16x1xf32> to vector<16x128xf32>
    %32 = arith.subf %26, %31 : vector<16x128xf32>
    %c0_14 = arith.constant 0 : index
    %c0_15 = arith.constant 0 : index
    %33 = vector.load %arg10[%c0_14, %c0_15] : memref<16x128xf32, #tpu.memory_space<vmem>>, vector<16x128xf32>
    tpu.vector_store %arg10[%c0_14, %c0_15], %32 {strides = array<i32>} : memref<16x128xf32, #tpu.memory_space<vmem>>, vector<16x128xf32>,
    return
  }
  func.func @transform_0(%arg0: i32) -> (i32, i32) {
    %c0_i32 = arith.constant 0 : i32
    %c0_i32_0 = arith.constant 0 : i32
    %c0_i32_1 = arith.constant 0 : i32
    return %c0_i32, %c0_i32_0 : i32, i32
  }
  func.func @transform_1(%arg0: i32) -> (i32, i32) {
    %c0_i32 = arith.constant 0 : i32
    %c0_i32_0 = arith.constant 0 : i32
    %c0_i32_1 = arith.constant 0 : i32
    return %c0_i32, %c0_i32_0 : i32, i32
  }
  func.func @transform_2(%arg0: i32) -> (i32, i32) {
    %c0_i32 = arith.constant 0 : i32
    %c0_i32_0 = arith.constant 0 : i32
    %c0_i32_1 = arith.constant 0 : i32
    return %c0_i32, %c0_i32_0 : i32, i32
  }
  func.func @transform_3(%arg0: i32) -> (i32, i32) {
    %c0_i32 = arith.constant 0 : i32
    %c0_i32_0 = arith.constant 0 : i32
    %c0_i32_1 = arith.constant 0 : i32
    return %c0_i32, %c0_i32_0 : i32, i32
  }
  func.func @transform_4(%arg0: i32) -> (i32, i32) {
    %c0_i32 = arith.constant 0 : i32
    %c0_i32_0 = arith.constant 0 : i32
    %c0_i32_1 = arith.constant 0 : i32
    return %c0_i32, %c0_i32_0 : i32, i32
  }
  func.func @transform_5(%arg0: i32) -> (i32, i32) {
    %c0_i32 = arith.constant 0 : i32
    %c0_i32_0 = arith.constant 0 : i32
    %c0_i32_1 = arith.constant 0 : i32
    return %c0_i32, %c0_i32_0 : i32, i32
  }
  func.func @transform_6(%arg0: i32) -> (i32, i32) {
    %c0_i32 = arith.constant 0 : i32
    %c0_i32_0 = arith.constant 0 : i32
    %c0_i32_1 = arith.constant 0 : i32
    return %c0_i32, %c0_i32_0 : i32, i32
  }
  func.func @transform_7(%arg0: i32) -> (i32, i32) {
    %c0_i32 = arith.constant 0 : i32
    %c0_i32_0 = arith.constant 0 : i32
    %c0_i32_1 = arith.constant 0 : i32
    return %c0_i32, %c0_i32_0 : i32, i32
  }
  func.func @transform_8(%arg0: i32) -> (i32, i32) {
    %c0_i32 = arith.constant 0 : i32
    %c0_i32_0 = arith.constant 0 : i32
    return %arg0, %c0_i32 : i32, i32
  }
  func.func @transform_9(%arg0: i32) -> (i32, i32) {
    %c0_i32 = arith.constant 0 : i32
    %c0_i32_0 = arith.constant 0 : i32
    return %arg0, %c0_i32 : i32, i32
  }
}

</mosaic_0001>

<bundles_post_ra>
// kernel: chebnet_forward.1
= control target key start
LH: loop header
LB: loop body
LE: loop exit
PB: predicated region body
PF: predicated region fallthrough
CT: control target
= control target key end

     0   :  { %v911_v0 = vmov 0.0   ;;  %vm912_vm0 = vmmov 0   ;;  %vm51_vm1 = vcmask 130048   ;;  %s1134_s0 = inlined_call_operand.vmem [shape: bf16[16,128], index: 0, kind: input, shape index: {}]   ;;  %s1135_s1 = inlined_call_operand.vmem [shape: bf16[16,16], index: 1, kind: input, shape index: {}]   ;;  %s1136_s2 = inlined_call_operand.vmem [shape: bf16[128,128], index: 2, kind: input, shape index: {}]   ;;  %s1137_s3 = inlined_call_operand.vmem [shape: bf16[128,128], index: 3, kind: input, shape index: {}]   ;;  %s1138_s6 = inlined_call_operand.vmem [shape: bf16[128,128], index: 6, kind: input, shape index: {}]   ;;  %s1139_s4 = inlined_call_operand.vmem [shape: f32[1,128], index: 4, kind: input, shape index: {}]   ;;  %s1140_s5 = inlined_call_operand.vmem [shape: bf16[128,128], index: 5, kind: input, shape index: {}]   ;;  %s1141_s7 = inlined_call_operand.vmem [shape: f32[1,128], index: 7, kind: input, shape index: {}]   ;;  %s1142_s8 = inlined_call_operand.vmem [shape: f32[16,128], index: 8, kind: output, shape index: {0}]   ;;  %s1143_s9 = inlined_call_operand.vmem [shape: f32[16,128], index: 9, kind: output, shape index: {1}]  }
   0x1   :  { %772 = vmatprep.subr.bf16.mxu1 %v911_v0  ;;  %v866_v1 = vld [vmem:[%s1134_s0] sm:$0xff]   ;;  %774 = vmatprep.mubr.msk.bf16.mxu1 %vm912_vm0, %v911_v0  ;;  %v868_v3 = vld [vmem:[%s1136_s2 + $0x38] sm:$0xff]   ;;  %v869_v4 = vld [vmem:[%s1136_s2 + $0x30] sm:$0xff]  }
   0x2   :  { %v867_v2 = vld [vmem:[%s1135_s1] sm:$0xff]   ;;  %798 = vmatprep.subr.bf16.mxu0 %v911_v0  ;;  %814 = vmatprep.mubr.msk.bf16.mxu0 %vm912_vm0, %v911_v0  ;;  %v870_v5 = vld [vmem:[%s1137_s3 + $0x38] sm:$0xff]   ;;  %v872_v6 = vld [vmem:[%s1137_s3 + $0x30] sm:$0xff]  }
   0x3   :  { %773 = vmatpush3.bf16.msra.mxu1 %v866_v1  ;;  %799 = vmatpush3.bf16.msra.mxu0 %v868_v3  ;;  %v871_v7 = vld [vmem:[%s1136_s2 + $0x28] sm:$0xff]   ;;  %v873_v9 = vld [vmem:[%s1136_s2 + $0x20] sm:$0xff]   ;;  %v875_v11 = vld [vmem:[%s1136_s2 + $0x18] sm:$0xff]  }
   0x4   :  { %778 = vmatprep.subr.bf16.mxu1 %v911_v0  ;;  %800 = vmatprep.subr.bf16.mxu0 %v911_v0  ;;  %v874_v8 = vld [vmem:[%s1137_s3 + $0x28] sm:$0xff]   ;;  %v876_v10 = vld [vmem:[%s1137_s3 + $0x20] sm:$0xff]   ;;  %v878_v12 = vld [vmem:[%s1137_s3 + $0x18] sm:$0xff]  }
   0x5   :  { %v877_v13 = vld [vmem:[%s1136_s2 + $0x10] sm:$0xff]   ;;  %v879_v15 = vld [vmem:[%s1136_s2 + $0x8] sm:$0xff]   ;;  %v881_v16 = vld [vmem:[%s1136_s2] sm:$0xff]  }
   0x6   :  { %775 = vmatmul.mubr.msk.bf16.vlgmr.msra.gmra.mxu1 %vm51_vm1, %v867_v2  ;;  %v880_v14 = vld [vmem:[%s1137_s3 + $0x10] sm:$0xff]   ;;  %v882_v17 = vld [vmem:[%s1137_s3 + $0x8] sm:$0xff]   ;;  %v883_v18 = vld [vmem:[%s1137_s3] sm:$0xff]  }
   0x7   :  { %779 = vmatpush3.bf16.msra.mxu1 %v870_v5  ;;  %794 = vmatprep.mubr.msk.bf16.mxu1 %vm912_vm0, %v911_v0  ;;  %v884_v22 = vld [vmem:[%s1138_s6 + $0x38] sm:$0xff]   ;;  %v885_v25 = vld [vmem:[%s1138_s6 + $0x30] sm:$0xff]   ;;  %v886_v26 = vld [vmem:[%s1138_s6 + $0x28] sm:$0xff]   ;;  %v634_v5 = vlaneseq }
   0x8   :  { %780 = vmatprep.subr.bf16.mxu1 %v911_v0  ;;  %801 = vmatpush3.bf16.msra.mxu0 %v869_v4  ;;  %v887_v27 = vld [vmem:[%s1138_s6 + $0x20] sm:$0xff]   ;;  %v888_v28 = vld [vmem:[%s1138_s6 + $0x18] sm:$0xff]   ;;  %v889_v33 = vld [vmem:[%s1138_s6 + $0x10] sm:$0xff]  }
   0x9   :  { %802 = vmatprep.subr.bf16.mxu0 %v911_v0  ;;  %v890_v34 = vld [vmem:[%s1138_s6 + $0x8] sm:$0xff]   ;;  %v891_v35 = vld [vmem:[%s1138_s6] sm:$0xff]   ;;  %v894_v55 = vld [vmem:[%s1140_s5 + $0x38] sm:$0xff]  }
   0xa   :  { %v692_v38 = vld [vmem:[%s1139_s4] ss:$0 sm:$0xff]  ;;  %v895_v56 = vld [vmem:[%s1140_s5 + $0x30] sm:$0xff]   ;;  %v896_v57 = vld [vmem:[%s1140_s5 + $0x28] sm:$0xff]  }
   0xb   :  { %781 = vmatpush3.bf16.msra.mxu1 %v872_v6  ;;  %v893_v54 = vld [vmem:[%s1135_s1] sm:$0xff]   ;;  %v898_v59 = vld [vmem:[%s1140_s5 + $0x18] sm:$0xff]   ;;  %v899_v60 = vld [vmem:[%s1140_s5 + $0x10] sm:$0xff]   ;;  %v635_v6 = vand.u32 127, %v634_v5 }
   0xc   :  { %782 = vmatprep.subr.bf16.mxu1 %v911_v0  ;;  %803 = vmatpush3.bf16.msra.mxu0 %v871_v7  ;;  %v897_v58 = vld [vmem:[%s1140_s5 + $0x20] sm:$0xff]   ;;  %v900_v61 = vld [vmem:[%s1140_s5 + $0x8] sm:$0xff]  }
   0xd   :  { %804 = vmatprep.subr.bf16.mxu0 %v911_v0  ;;  %v901_v62 = vld [vmem:[%s1140_s5] sm:$0xff]   ;;  %vm636_vm2 = vcmp.lt.s32.totalorder %v635_v6, 4 }
   0xf   :  { %783 = vmatpush3.bf16.msra.mxu1 %v874_v8  ;;  %v717_v8 = vld [vmem:[%s1141_s7] ss:$0 sm:$0xff] }
  0x10   :  { %784 = vmatprep.subr.bf16.mxu1 %v911_v0  ;;  %805 = vmatpush3.bf16.msra.mxu0 %v873_v9 }
  0x11   :  { %806 = vmatprep.subr.bf16.mxu0 %v911_v0 }
  0x13   :  { %785 = vmatpush3.bf16.msra.mxu1 %v876_v10 }
  0x14   :  { %786 = vmatprep.subr.bf16.mxu1 %v911_v0  ;;  %807 = vmatpush3.bf16.msra.mxu0 %v875_v11 }
  0x15   :  { %808 = vmatprep.subr.bf16.mxu0 %v911_v0 }
  0x17   :  { %787 = vmatpush3.bf16.msra.mxu1 %v878_v12 }
  0x18   :  { %788 = vmatprep.subr.bf16.mxu1 %v911_v0  ;;  %809 = vmatpush3.bf16.msra.mxu0 %v877_v13 }
  0x19   :  { %810 = vmatprep.subr.bf16.mxu0 %v911_v0 }
  0x1b   :  { %789 = vmatpush3.bf16.msra.mxu1 %v880_v14 }
  0x1c   :  { %790 = vmatprep.subr.bf16.mxu1 %v911_v0  ;;  %811 = vmatpush3.bf16.msra.mxu0 %v879_v15 }
  0x1d   :  { %812 = vmatprep.subr.bf16.mxu0 %v911_v0 }
  0x1f   :  { %791 = vmatpush3.bf16.msra.mxu1 %v882_v17 }
  0x20   :  { %813 = vmatpush3.bf16.msra.mxu0 %v881_v16  ;;  %792 = vmatprep.subr.bf16.mxu1 %v911_v0 }
  0x21   :  { %838 = vmatprep.subr.bf16.mxu0 %v911_v0 }
  0x23   :  { %815 = vmatmul.mubr.bf16.vlgmr.msra.gmra.mxu0 %v866_v1  ;;  %793 = vmatpush3.bf16.msra.mxu1 %v883_v18 }
  0x24   :  { %840 = vmatprep.mubr.msk.bf16.mxu0 %vm912_vm0, %v911_v0  ;;  %818 = vmatprep.subr.bf16.mxu1 %v911_v0 }
  0xc6   :  { %v89_v19 = vpop.f32.mrf.mxu1 }
  0xc8   :  { %v776_v20 = vpop.f32.mrf.mxu1 }
  0xca   :  { %v92_v21 = vpop.f32.mrf.mxu1 }
  0xcb   :  { %v112_v23 = vpack.c.bf16 %v92_v21, %v89_v19 }
  0xcc   :  { %v777_v24 = vpop.f32.mrf.mxu1 }
  0xcd   :  { %795 = vmatmul.mubr.bf16.vlgmr.msra.gmra.mxu1 %v112_v23 }
  0xce   :  { %819 = vmatpush3.bf16.msra.mxu1 %v884_v22  ;;  %834 = vmatprep.mubr.msk.bf16.mxu1 %vm912_vm0, %v911_v0 }
  0xcf   :  { %820 = vmatprep.subr.bf16.mxu1 %v911_v0 }
  0xd2   :  { %821 = vmatpush3.bf16.msra.mxu1 %v885_v25 }
  0xd3   :  { %822 = vmatprep.subr.bf16.mxu1 %v911_v0 }
  0xd6   :  { %823 = vmatpush3.bf16.msra.mxu1 %v886_v26 }
  0xd7   :  { %824 = vmatprep.subr.bf16.mxu1 %v911_v0 }
  0xda   :  { %825 = vmatpush3.bf16.msra.mxu1 %v887_v27 }
  0xdb   :  { %826 = vmatprep.subr.bf16.mxu1 %v911_v0 }
  0xde   :  { %827 = vmatpush3.bf16.msra.mxu1 %v888_v28 }
  0xdf   :  { %828 = vmatprep.subr.bf16.mxu1 %v911_v0 }
  0xe2   :  { %829 = vmatpush3.bf16.msra.mxu1 %v889_v33 }
  0xe3   :  { %v300_v29 = vpop.f32.mrf.mxu0  ;;  %830 = vmatprep.subr.bf16.mxu1 %v911_v0 }
  0xe5   :  { %v816_v30 = vpop.f32.mrf.mxu0 }
  0xe6   :  { %831 = vmatpush3.bf16.msra.mxu1 %v890_v34 }
  0xe7   :  { %v303_v31 = vpop.f32.mrf.mxu0  ;;  %832 = vmatprep.subr.bf16.mxu1 %v911_v0 }
  0xe9   :  { %v817_v32 = vpop.f32.mrf.mxu0 }
  0xea   :  { %833 = vmatpush3.bf16.msra.mxu1 %v891_v35 }
 0x18d   :  { %v211_v36 = vpop.f32.mrf.mxu1 }
 0x18e   :  { %v301_v37 = vadd.f32 %v300_v29, %v211_v36 }
 0x18f   :  { %v796_v39 = vpop.f32.mrf.mxu1 }
 0x190   :  { %v314_v41 = vadd.f32 %v692_v38, %v301_v37 }
 0x191   :  { %v214_v40 = vpop.f32.mrf.mxu1 }
 0x192   :  { %v304_v42 = vadd.f32 %v303_v31, %v214_v40  ;;  %v316_v45 = vmax.f32 %v314_v41, 0.0 }
 0x193   :  { %v797_v43 = vpop.f32.mrf.mxu1 }
 0x194   :  { %v315_v44 = vadd.f32 %v692_v38, %v304_v42 }
 0x196   :  { %v317_v46 = vmax.f32 %v315_v44, 0.0 }
 0x198   :  { %v318_v47 = vpack.c.bf16 %v317_v46, %v316_v45 }
 0x19a   :  { %726 = vst [vmem:[#allocation2] sm:$0xff] %v318_v47   ;;  %835 = vmatmul.mubr.bf16.vlgmr.msra.gmra.mxu1 %v318_v47 }
 0x1a1   :  { %v902_v63 = vld [vmem:[#allocation2] sm:$0xff]  }
 0x25a   :  { %v426_v48 = vpop.f32.mrf.mxu1 }
 0x25c   :  { %v836_v49 = vpop.f32.mrf.mxu1 }
 0x25e   :  { %v429_v50 = vpop.f32.mrf.mxu1 }
 0x25f   :  { %v730_v51 = vpack.c.bf16 %v429_v50, %v426_v48 }
 0x260   :  { %v837_v52 = vpop.f32.mrf.mxu1 }
 0x261   :  { %731 = vst [vmem:[#allocation3] sm:$0xff] %v730_v51  }
 0x268   :  { %v892_v53 = vld [vmem:[#allocation3] sm:$0xff]  }
 0x269   :  { %839 = vmatpush3.bf16.msra.mxu0 %v892_v53 }
 0x26a   :  { %844 = vmatprep.subr.bf16.mxu0 %v911_v0 }
 0x26c   :  { %841 = vmatmul.mubr.msk.bf16.vlgmr.msra.gmra.mxu0 %vm51_vm1, %v893_v54 }
 0x26d   :  { %845 = vmatpush3.bf16.msra.mxu0 %v894_v55  ;;  %860 = vmatprep.mubr.msk.bf16.mxu0 %vm912_vm0, %v911_v0 }
 0x26e   :  { %846 = vmatprep.subr.bf16.mxu0 %v911_v0 }
 0x271   :  { %847 = vmatpush3.bf16.msra.mxu0 %v895_v56 }
 0x272   :  { %848 = vmatprep.subr.bf16.mxu0 %v911_v0 }
 0x275   :  { %849 = vmatpush3.bf16.msra.mxu0 %v896_v57 }
 0x276   :  { %850 = vmatprep.subr.bf16.mxu0 %v911_v0 }
 0x279   :  { %851 = vmatpush3.bf16.msra.mxu0 %v897_v58 }
 0x27a   :  { %852 = vmatprep.subr.bf16.mxu0 %v911_v0 }
 0x27d   :  { %853 = vmatpush3.bf16.msra.mxu0 %v898_v59 }
 0x27e   :  { %854 = vmatprep.subr.bf16.mxu0 %v911_v0 }
 0x281   :  { %855 = vmatpush3.bf16.msra.mxu0 %v899_v60 }
 0x282   :  { %856 = vmatprep.subr.bf16.mxu0 %v911_v0 }
 0x285   :  { %857 = vmatpush3.bf16.msra.mxu0 %v900_v61 }
 0x286   :  { %858 = vmatprep.subr.bf16.mxu0 %v911_v0 }
 0x289   :  { %859 = vmatpush3.bf16.msra.mxu0 %v901_v62 }
 0x28c   :  { %861 = vmatmul.mubr.bf16.vlgmr.msra.gmra.mxu0 %v902_v63 }
 0x32c   :  { %v521_v1 = vpop.f32.mrf.mxu0 }
 0x32e   :  { %v842_v2 = vpop.f32.mrf.mxu0 }
 0x330   :  { %v524_v3 = vpop.f32.mrf.mxu0 }
 0x332   :  { %v843_v4 = vpop.f32.mrf.mxu0 }
 0x34c   :  { %v616_v7 = vpop.f32.mrf.mxu0 }
 0x34d   :  { %v617_v9 = vadd.f32 %v616_v7, %v521_v1 }
 0x34e   :  { %v862_v10 = vpop.f32.mrf.mxu0 }
 0x34f   :  { %v630_v11 = vadd.f32 %v717_v8, %v617_v9 }
 0x350   :  { %v619_v12 = vpop.f32.mrf.mxu0 }
 0x351   :  { %v620_v0 = vadd.f32 %v619_v12, %v524_v3  ;;  %v637_v13 = vsel %vm636_vm2, %v630_v11, -1e+30  ;;  %632 = vst [vmem:[%s1142_s8] sm:$0xff] %v630_v11 }
 0x352   :  { %639 = vmax.xlane.f32.xlu0 %v637_v13  ;;  %v863_v14 = vpop.f32.mrf.mxu0 }
 0x353   :  { %v631_v15 = vadd.f32 %v717_v8, %v620_v0 }
 0x355   :  { %v638_v16 = vsel %vm636_vm2, %v631_v15, -1e+30  ;;  %633 = vst [vmem:[%s1142_s8 + $0x8] sm:$0xff] %v631_v15 }
 0x356   :  { %641 = vmax.xlane.f32.xlu0 %v638_v16 }
 0x3db   :  { %v640_v17 = vpop.xlane.xlu0 %639 }
 0x3dc   :  { %v643_v18 = vsub.f32 %v637_v13, %v640_v17 }
 0x3de   :  { %v645_v19 = vmul.f32 1.442695, %v643_v18 }
 0x3df   :  { %v642_v20 = vpop.xlane.xlu0 %641 }
 0x3e0   :  { %v644_v21 = vsub.f32 %v638_v16, %v642_v20  ;;  %903 = vpow2.f32 %v645_v19 }
 0x3e2   :  { %v647_v22 = vmul.f32 1.442695, %v644_v21 }
 0x3e4   :  { %905 = vpow2.f32 %v647_v22 }
 0x3ed   :  { %v904_v23 = vpop.eup %903 }
 0x3ee   :  { %649 = vadd.xlane.f32.xlu1 %v904_v23 }
 0x3f1   :  { %v906_v24 = vpop.eup %905 }
 0x3f2   :  { %651 = vadd.xlane.f32.xlu1 %v906_v24 }
 0x477   :  { %v650_v25 = vpop.xlane.xlu1 %649 }
 0x478   :  { %907 = vlog2.f32 %v650_v25 }
 0x47b   :  { %v652_v26 = vpop.xlane.xlu1 %651 }
 0x47c   :  { %909 = vlog2.f32 %v652_v26 }
 0x485   :  { %v908_v27 = vpop.eup %907 }
 0x486   :  { %v654_v28 = vmul.f32 0.6931472, %v908_v27 }
 0x488   :  { %v657_v29 = vsub.f32 %v643_v18, %v654_v28 }
 0x489   :  { %v910_v30 = vpop.eup %909 }
 0x48a   :  { %659 = vst [vmem:[%s1143_s9] sm:$0xff] %v657_v29  ;;  %v656_v31 = vmul.f32 0.6931472, %v910_v30 }
 0x48c   :  { %v658_v32 = vsub.f32 %v644_v21, %v656_v31 }
 0x48e   :  { %660 = vst [vmem:[%s1143_s9 + $0x8] sm:$0xff] %v658_v32 }

</bundles_post_ra>
